<compile_context>
chip_gen: v7x
topology: tpu7x:2x2x1
jax: 0.10.0
libtpu: 0.0.40
codegen_flags: <defaults>
</compile_context>

<pallas_src>
import jax
import jax.numpy as jnp
from jax.experimental import pallas as pl
from jax.experimental.pallas import tpu as pltpu


def _ffn_kernel(x_ref, w1_ref, b1_ref, w2_ref, b2_ref, o_ref, acc_ref):
    # x_ref : (tm, C_in)         w1_ref: (C_in, FFC)   b1_ref: (1, FFC)
    # w2_ref: (FFC, C_out)       b2_ref: (1, C_out)
    # o_ref : (tm, C_out)        acc_ref: (tm, C_out) f32 scratch
    k = pl.program_id(1)  # FF-chunk index (innermost, "arbitrary")

    # Fold b2 into the accumulator init so the epilogue is a pure cast + store.
    @pl.when(k == 0)
    def _init():
        acc_ref[...] = jnp.broadcast_to(
            b2_ref[...].astype(jnp.float32), acc_ref.shape)

    # First matmul on this FF chunk (MXU, f32 accumulation).
    h = jnp.dot(x_ref[...], w1_ref[...], preferred_element_type=jnp.float32)
    h = h + b1_ref[...].astype(jnp.float32)       # bias + GELU stay in f32
    # TODO(synk): PyTorch F.gelu defaults to the exact erf GELU; the tanh
    # approximation is used here because it lowers cleanly to the EUP.
    h = jax.nn.gelu(h, approximate=True)
    # TODO(synk): training-mode dropout (pltpu.prng_random_bits mask) omitted;
    # eval-mode dropout is the identity.

    # Second matmul: accumulate this FF chunk's contribution.
    acc_ref[...] += jnp.dot(h.astype(w2_ref.dtype), w2_ref[...],
                            preferred_element_type=jnp.float32)

    @pl.when(k == pl.num_programs(1) - 1)
    def _finalize():
        o_ref[...] = acc_ref[...].astype(o_ref.dtype)


def _pick_ff_chunk(ff_dim, max_chunk=512):
    """Largest lane-aligned chunk that divides ff_dim exactly (else no chunking)."""
    for c in (512, 256, 128):
        if c <= max_chunk and ff_dim >= c and ff_dim % c == 0:
            return c
    return ff_dim


def feed_forward(x, w1, b1, w2, b2, *, block_m: int = 256, max_ff_chunk: int = 512,
                 compute_dtype=jnp.bfloat16):
    """Mirrors FeedForward.forward(x) (eval mode) for x of shape (..., C_in)."""
    orig_lead = x.shape[:-1]
    c_in = x.shape[-1]
    ff_dim = w1.shape[1]
    c_out = w2.shape[1]
    out_dtype = x.dtype

    m = 1
    for d in orig_lead:
        m *= d
    x2 = x.reshape(m, c_in)

    # bf16 MXU inputs; biases stay f32 (bias add / GELU / accumulation in f32).
    x2 = x2.astype(compute_dtype)
    w1c = w1.astype(compute_dtype)
    w2c = w2.astype(compute_dtype)
    b1_2d = b1.reshape(1, ff_dim).astype(jnp.float32)
    b2_2d = b2.reshape(1, c_out).astype(jnp.float32)

    # Row tile: full extent for small m (single block), otherwise block_m.
    # No wrapper-side pad: Pallas masks the ragged boundary row block.
    tm = m if m <= block_m else block_m
    ff_chunk = _pick_ff_chunk(ff_dim, max_ff_chunk)

    grid = (pl.cdiv(m, tm), ff_dim // ff_chunk)

    # Explicit scoped-VMEM budget from the actual buffer sizes
    # (double-buffered inputs/outputs + f32 accumulator + headroom).
    cbytes = jnp.dtype(compute_dtype).itemsize
    obytes = jnp.dtype(out_dtype).itemsize
    buf_bytes = (tm * c_in * cbytes            # x row tile
                 + c_in * ff_chunk * cbytes    # W1 chunk
                 + ff_chunk * 4                # b1 chunk
                 + ff_chunk * c_out * cbytes   # W2 chunk
                 + c_out * 4                   # b2
                 + tm * c_out * obytes)        # out tile
    vmem_limit = 2 * buf_bytes + tm * c_out * 4 + (4 << 20)
    vmem_limit = max(min(int(vmem_limit), 64 << 20), 32 << 20)

    # Advisory cost hint so XLA schedules around the kernel sensibly.
    flops = 2 * m * (c_in * ff_dim + ff_dim * c_out)
    transcendentals = m * ff_dim
    bytes_accessed = (cbytes * (m * c_in + c_in * ff_dim + ff_dim * c_out)
                      + 4 * (ff_dim + c_out)
                      + obytes * m * c_out)

    out = pl.pallas_call(
        _ffn_kernel,
        out_shape=jax.ShapeDtypeStruct((m, c_out), out_dtype),
        grid_spec=pltpu.PrefetchScalarGridSpec(
            num_scalar_prefetch=0,
            grid=grid,
            in_specs=[
                pl.BlockSpec((tm, c_in), lambda i, k: (i, 0)),         # x row tile
                pl.BlockSpec((c_in, ff_chunk), lambda i, k: (0, k)),   # W1 FF chunk (streamed)
                pl.BlockSpec((1, ff_chunk), lambda i, k: (0, k)),      # b1 chunk
                pl.BlockSpec((ff_chunk, c_out), lambda i, k: (k, 0)),  # W2 FF chunk (streamed)
                pl.BlockSpec((1, c_out), lambda i, k: (0, 0)),         # b2
            ],
            out_specs=pl.BlockSpec((tm, c_out), lambda i, k: (i, 0)),
            scratch_shapes=[pltpu.VMEM((tm, c_out), jnp.float32)],
        ),
        compiler_params=pltpu.CompilerParams(
            dimension_semantics=("parallel", "arbitrary"),
            vmem_limit_bytes=vmem_limit,
        ),
        cost_estimate=pl.CostEstimate(
            flops=flops,
            transcendentals=transcendentals,
            bytes_accessed=bytes_accessed,
        ),
    )(x2, w1c, b1_2d, w2c, b2_2d)

    return out.reshape(*orig_lead, c_out)


if __name__ == "__main__":
    batch, seq, c_in, ff_dim, c_out = 2, 8, 32, 64, 32

    key = jax.random.PRNGKey(0)
    kx, k1, kb1, k2, kb2 = jax.random.split(key, 5)
    x = jax.random.normal(kx, (batch, seq, c_in), dtype=jnp.float32)
    w1 = jax.random.normal(k1, (c_in, ff_dim), dtype=jnp.float32) * 0.05
    b1 = jax.random.normal(kb1, (ff_dim,), dtype=jnp.float32) * 0.05
    w2 = jax.random.normal(k2, (ff_dim, c_out), dtype=jnp.float32) * 0.05
    b2 = jax.random.normal(kb2, (c_out,), dtype=jnp.float32) * 0.05

    y = feed_forward(x, w1, b1, w2, b2)
    y = jax.block_until_ready(y)

    # Pure-JAX reference with the same bf16 MXU inputs / f32 accumulation
    # (eval-mode dropout == identity).
    xb = x.reshape(-1, c_in).astype(jnp.bfloat16)
    h_ref = jnp.dot(xb, w1.astype(jnp.bfloat16),
                    preferred_element_type=jnp.float32) + b1
    h_ref = jax.nn.gelu(h_ref, approximate=True)
    ref = jnp.dot(h_ref.astype(jnp.bfloat16), w2.astype(jnp.bfloat16),
                  preferred_element_type=jnp.float32) + b2
    ref = ref.astype(x.dtype).reshape(batch, seq, c_out)

    assert y.shape == (batch, seq, c_out), y.shape
    err = float(jnp.max(jnp.abs(y.astype(jnp.float32) - ref.astype(jnp.float32))))
    assert err < 2e-2, f"mismatch vs reference: max abs err = {err}"

    print("KERNEL_OK")
</pallas_src>

<mosaic_0001>
module attributes {stable_mosaic.version = 11 : i64} {
  func.func @_ffn_kernel(%arg0: i32, %arg1: i32, %arg2: memref<16x32xbf16, #tpu.memory_space<vmem>>, %arg3: memref<32x64xbf16, #tpu.memory_space<vmem>>, %arg4: memref<1x64xf32, #tpu.memory_space<vmem>>, %arg5: memref<64x32xbf16, #tpu.memory_space<vmem>>, %arg6: memref<1x32xf32, #tpu.memory_space<vmem>>, %arg7: memref<16x32xf32, #tpu.memory_space<vmem>>, %arg8: memref<16x32xf32, #tpu.memory_space<vmem>>) attributes {dimension_semantics = [#tpu.dimension_semantics<parallel>, #tpu.dimension_semantics<arbitrary>], iteration_bounds = array<i64: 1, 1>, scalar_prefetch = 0 : i64, scratch_operands = 1 : i64, tpu.core_type = #tpu.core_type<tc>, window_params = [{transform_indices = @transform_0, window_bounds = array<i64: 16, 32>}, {transform_indices = @transform_1, window_bounds = array<i64: 32, 64>}, {transform_indices = @transform_2, window_bounds = array<i64: 1, 64>}, {transform_indices = @transform_3, window_bounds = array<i64: 64, 32>}, {pipeline_mode = #tpu.pipeline_mode<synchronous>, transform_indices = @transform_4, window_bounds = array<i64: 1, 32>}, {transform_indices = @transform_5, window_bounds = array<i64: 16, 32>}]} {
    %c0_i32 = arith.constant 0 : i32
    %0 = arith.cmpi eq, %arg1, %c0_i32 : i32
    %1 = arith.extui %0 : i1 to i32
    %c0_i32_0 = arith.constant 0 : i32
    %2 = arith.cmpi ne, %1, %c0_i32_0 : i32
    scf.if %2 {
      %c0_19 = arith.constant 0 : index
      %c0_20 = arith.constant 0 : index
      %31 = vector.load %arg6[%c0_19, %c0_20] : memref<1x32xf32, #tpu.memory_space<vmem>>, vector<1x32xf32>
      %32 = vector.shape_cast %31 : vector<1x32xf32> to vector<1x32xf32>
      %33 = vector.broadcast %32 : vector<1x32xf32> to vector<16x32xf32>
      %c0_21 = arith.constant 0 : index
      %c0_22 = arith.constant 0 : index
      %34 = vector.load %arg8[%c0_21, %c0_22] : memref<16x32xf32, #tpu.memory_space<vmem>>, vector<16x32xf32>
      tpu.vector_store %arg8[%c0_21, %c0_22], %33 {strides = array<i32>} : memref<16x32xf32, #tpu.memory_space<vmem>>, vector<16x32xf32>,
    } else {
    }
    %c0 = arith.constant 0 : index
    %c0_1 = arith.constant 0 : index
    %3 = vector.load %arg2[%c0, %c0_1] : memref<16x32xbf16, #tpu.memory_space<vmem>>, vector<16x32xbf16>
    %c0_2 = arith.constant 0 : index
    %c0_3 = arith.constant 0 : index
    %4 = vector.load %arg3[%c0_2, %c0_3] : memref<32x64xbf16, #tpu.memory_space<vmem>>, vector<32x64xbf16>
    %cst = arith.constant dense<0.000000e+00> : vector<16x64xf32>
    %5 = tpu.matmul %3, %4, %cst {dimension_numbers = #tpu.dot_dimension_numbers<[1], [0], [0], [1], [0, 0, 1, 1], [], []>} : vector<16x32xbf16>, vector<32x64xbf16>, vector<16x64xf32> -> vector<16x64xf32>
    %c0_4 = arith.constant 0 : index
    %c0_5 = arith.constant 0 : index
    %6 = vector.load %arg4[%c0_4, %c0_5] : memref<1x64xf32, #tpu.memory_space<vmem>>, vector<1x64xf32>
    %7 = vector.broadcast %6 : vector<1x64xf32> to vector<16x64xf32>
    %8 = arith.addf %5, %7 : vector<16x64xf32>
    %9 = arith.mulf %8, %8 : vector<16x64xf32>
    %10 = arith.mulf %8, %9 : vector<16x64xf32>
    %cst_6 = arith.constant 4.471500e-02 : f32
    %11 = vector.broadcast %cst_6 : f32 to vector<16x64xf32>
    %12 = arith.mulf %11, %10 : vector<16x64xf32>
    %13 = arith.addf %8, %12 : vector<16x64xf32>
    %cst_7 = arith.constant 0.797884583 : f32
    %14 = vector.broadcast %cst_7 : f32 to vector<16x64xf32>
    %15 = arith.mulf %14, %13 : vector<16x64xf32>
    %16 = math.tanh %15 : vector<16x64xf32>
    %cst_8 = arith.constant 1.000000e+00 : f32
    %17 = vector.broadcast %cst_8 : f32 to vector<16x64xf32>
    %18 = arith.addf %17, %16 : vector<16x64xf32>
    %cst_9 = arith.constant 5.000000e-01 : f32
    %19 = vector.broadcast %cst_9 : f32 to vector<16x64xf32>
    %20 = arith.mulf %19, %18 : vector<16x64xf32>
    %21 = arith.mulf %8, %20 : vector<16x64xf32>
    %c0_10 = arith.constant 0 : index
    %c0_11 = arith.constant 0 : index
    %22 = vector.load %arg8[%c0_10, %c0_11] : memref<16x32xf32, #tpu.memory_space<vmem>>, vector<16x32xf32>
    %23 = arith.truncf %21 : vector<16x64xf32> to vector<16x64xbf16>
    %c0_12 = arith.constant 0 : index
    %c0_13 = arith.constant 0 : index
    %24 = vector.load %arg5[%c0_12, %c0_13] : memref<64x32xbf16, #tpu.memory_space<vmem>>, vector<64x32xbf16>
    %cst_14 = arith.constant dense<0.000000e+00> : vector<16x32xf32>
    %25 = tpu.matmul %23, %24, %cst_14 {dimension_numbers = #tpu.dot_dimension_numbers<[1], [0], [0], [1], [0, 0, 1, 1], [], []>} : vector<16x64xbf16>, vector<64x32xbf16>, vector<16x32xf32> -> vector<16x32xf32>
    %26 = arith.addf %22, %25 : vector<16x32xf32>
    %c0_15 = arith.constant 0 : index
    %c0_16 = arith.constant 0 : index
    %27 = vector.load %arg8[%c0_15, %c0_16] : memref<16x32xf32, #tpu.memory_space<vmem>>, vector<16x32xf32>
    tpu.vector_store %arg8[%c0_15, %c0_16], %26 {strides = array<i32>} : memref<16x32xf32, #tpu.memory_space<vmem>>, vector<16x32xf32>,
    %c0_i32_17 = arith.constant 0 : i32
    %28 = arith.cmpi eq, %arg1, %c0_i32_17 : i32
    %29 = arith.extui %28 : i1 to i32
    %c0_i32_18 = arith.constant 0 : i32
    %30 = arith.cmpi ne, %29, %c0_i32_18 : i32
    scf.if %30 {
      %c0_19 = arith.constant 0 : index
      %c0_20 = arith.constant 0 : index
      %31 = vector.load %arg8[%c0_19, %c0_20] : memref<16x32xf32, #tpu.memory_space<vmem>>, vector<16x32xf32>
      %c0_21 = arith.constant 0 : index
      %c0_22 = arith.constant 0 : index
      %32 = vector.load %arg7[%c0_21, %c0_22] : memref<16x32xf32, #tpu.memory_space<vmem>>, vector<16x32xf32>
      tpu.vector_store %arg7[%c0_21, %c0_22], %31 {strides = array<i32>} : memref<16x32xf32, #tpu.memory_space<vmem>>, vector<16x32xf32>,
    } else {
    }
    return
  }
  func.func @transform_0(%arg0: i32, %arg1: i32) -> (i32, i32) {
    %c0_i32 = arith.constant 0 : i32
    %c0_i32_0 = arith.constant 0 : i32
    return %arg0, %c0_i32 : i32, i32
  }
  func.func @transform_1(%arg0: i32, %arg1: i32) -> (i32, i32) {
    %c0_i32 = arith.constant 0 : i32
    %c0_i32_0 = arith.constant 0 : i32
    return %c0_i32, %arg1 : i32, i32
  }
  func.func @transform_2(%arg0: i32, %arg1: i32) -> (i32, i32) {
    %c0_i32 = arith.constant 0 : i32
    %c0_i32_0 = arith.constant 0 : i32
    return %c0_i32, %arg1 : i32, i32
  }
  func.func @transform_3(%arg0: i32, %arg1: i32) -> (i32, i32) {
    %c0_i32 = arith.constant 0 : i32
    %c0_i32_0 = arith.constant 0 : i32
    return %arg1, %c0_i32 : i32, i32
  }
  func.func @transform_4(%arg0: i32, %arg1: i32) -> (i32, i32) {
    %c0_i32 = arith.constant 0 : i32
    %c0_i32_0 = arith.constant 0 : i32
    %c0_i32_1 = arith.constant 0 : i32
    return %c0_i32, %c0_i32_0 : i32, i32
  }
  func.func @transform_5(%arg0: i32, %arg1: i32) -> (i32, i32) {
    %c0_i32 = arith.constant 0 : i32
    %c0_i32_0 = arith.constant 0 : i32
    return %arg0, %c0_i32 : i32, i32
  }
}

</mosaic_0001>

<bundles_post_ra>
// kernel: tpu_custom_call.1
= control target key start
LH: loop header
LB: loop body
LE: loop exit
PB: predicated region body
PF: predicated region fallthrough
CT: control target
= control target key end

     0   :  { %v315_v1 = vmov 0.0   ;;  %vm316_vm0 = vmmov 0   ;;  %vm33_vm1 = vcmask 261120   ;;  %s396_s0 = inlined_call_operand.vmem [shape: bf16[16,32], index: 0, kind: input, shape index: {}]   ;;  %s397_s1 = inlined_call_operand.vmem [shape: bf16[32,64], index: 1, kind: input, shape index: {}]   ;;  %s398_s2 = inlined_call_operand.vmem [shape: f32[1,64], index: 2, kind: input, shape index: {}]   ;;  %s399_s3 = inlined_call_operand.vmem [shape: bf16[64,32], index: 3, kind: input, shape index: {}]   ;;  %s400_s4 = inlined_call_operand.vmem [shape: f32[1,32], index: 4, kind: input, shape index: {}]   ;;  %s401_s5 = inlined_call_operand.hbm [shape: f32[16,32], index: 5, kind: output, shape index: {}]  }
   0x1   :  { %v280_v0 = vld [vmem:[%s397_s1] sm:$0xff]   ;;  %255 = vmatprep.subr.bf16.mxu0 %v315_v1  ;;  %263 = vmatprep.subr.bf16.mxu1 %v315_v1  ;;  %v281_v2 = vld [vmem:[%s397_s1 + $0x8] sm:$0xff]  }
   0x2   :  { %256 = vmatpush3.bf16.msra.mxu0 %v280_v0  ;;  %259 = vmatprep.mubr.msk.bf16.mxu0 %vm316_vm0, %v315_v1  ;;  %v282_v3 = vld [vmem:[%s396_s0] sm:$0xff]  }
   0x3   :  { %257 = vmatprep.subr.bf16.mxu0 %v315_v1  ;;  %271 = vmatprep.mubr.msk.bf16.mxu1 %vm316_vm0, %v315_v1 }
   0x6   :  { %258 = vmatpush3.bf16.msra.mxu0 %v281_v2 }
   0x7   :  { %10 = vsyncpa [#allocation4], 0  ;;  %v283_v4 = vld [vmem:[%s399_s3] sm:$0xff]   ;;  %v284_v5 = vld [vmem:[%s399_s3 + $0x8] sm:$0xff]   ;;  %vm164_vm2 = vcmask 523264  }
   0x8   :  { %264 = vmatpush3.bf16.msra.mxu1 %v283_v4  ;;  %v285_v6 = vld [vmem:[%s399_s3 + $0x10] sm:$0xff]   ;;  %v286_v7 = vld [vmem:[%s399_s3 + $0x18] sm:$0xff]   ;;  %v236_v8 = vld [vmem:[%s400_s4] ss:$0 sm:$0xff] }
   0x9   :  { %260 = vmatmul.mubr.msk.bf16.vlgmr.msra.gmra.mrb[0].mxu0 %vm33_vm1, %v282_v3  ;;  %265 = vmatprep.subr.bf16.mxu1 %v315_v1  ;;  %34 = vst.msk [vmem:[#allocation2] sm:$0xff] %vm33_vm1, %v236_v8  ;;  %35 = vst.msk [vmem:[#allocation2 + $0x8] sm:$0xff] %vm33_vm1, %v236_v8  ;;  %v237_v9 = vld [vmem:[%s398_s2] ss:$0 sm:$0xff]  ;;  %s317_s2 = smov [#allocation3]  }
   0xa   :  { %s225_s3 = sshll.u32 %s317_s2, 4  ;;  %s226_s3 = int_to_ptr.vmem [resolvable:$true] %s225_s3 }
   0xb   :  { %s291_s4 = scalar_lea.vmem %s226_s3, 256  ;;  %p296_p1 = scmp.lt.s32.totalorder %s226_s3, %s226_s3 }
   0xc   :  { %266 = vmatpush3.bf16.msra.mxu1 %v284_v5  ;;  %p292_p0 = scmp.ne.s32.totalorder %s226_s3, %s291_s4  ;;  %p297_p2 = scmp.lt.s32.totalorder %s291_s4, %s291_s4 }
   0xd   :  { %267 = vmatprep.subr.bf16.mxu1 %v315_v1 }
   0xe   :  { %p298_p3 = por %p297_p2, %p296_p1 }
  0x10   :  { %268 = vmatpush3.bf16.msra.mxu1 %v285_v6  ;;  %v129_v35 = vld [vmem:[#allocation2] sm:$0xff]  ;;  %v130_v37 = vld [vmem:[#allocation2 + $0x8] sm:$0xff]  ;;  %p299_p4 = pnand %p298_p3, %p292_p0 }
  0x11   :  { %269 = vmatprep.subr.bf16.mxu1 %v315_v1 }
  0x14   :  { %270 = vmatpush3.bf16.msra.mxu1 %v286_v7 }
  0xdc   :  { %v104_v10 = vpop.f32.mrb[0].mxu0 }
  0xdd   :  { %v105_v11 = vadd.f32 %v237_v9, %v104_v10  ;;  %v261_v12 = vpop.f32.mrb[1].mxu0 }
  0xde   :  { %v107_v13 = vpop.f32.mrb[2].mxu0 }
  0xdf   :  { %v111_v14 = vmul.f32 %v105_v11, %v105_v11  ;;  %v108_v15 = vadd.f32 %v237_v9, %v107_v13  ;;  %v262_v16 = vpop.f32.mrb[3].mxu0 }
  0xe1   :  { %v113_v17 = vmul.f32 %v111_v14, %v105_v11  ;;  %v112_v18 = vmul.f32 %v108_v15, %v108_v15 }
  0xe3   :  { %v115_v19 = vmul.f32 0.044715, %v113_v17  ;;  %v114_v20 = vmul.f32 %v112_v18, %v108_v15 }
  0xe5   :  { %v117_v21 = vadd.f32 %v115_v19, %v105_v11  ;;  %v116_v22 = vmul.f32 0.044715, %v114_v20 }
  0xe7   :  { %v119_v23 = vmul.f32 0.7978846, %v117_v21  ;;  %v118_v24 = vadd.f32 %v116_v22, %v108_v15 }
  0xe9   :  { %287 = vtanh.f32 %v119_v23  ;;  %v120_v25 = vmul.f32 0.7978846, %v118_v24 }
  0xeb   :  { %289 = vtanh.f32 %v120_v25 }
  0xf3   :  { %v288_v26 = vpop.eup %287 }
  0xf4   :  { %v123_v27 = vadd.f32 1.0, %v288_v26 }
  0xf5   :  { %v290_v28 = vpop.eup %289 }
  0xf6   :  { %v125_v29 = vmul.f32 0.5, %v123_v27  ;;  %v124_v30 = vadd.f32 1.0, %v290_v28 }
  0xf8   :  { %v126_v31 = vmul.f32 0.5, %v124_v30  ;;  %v127_v32 = vmul.f32 %v125_v29, %v105_v11 }
  0xfa   :  { %v128_v33 = vmul.f32 %v126_v31, %v108_v15 }
  0xfc   :  { %v131_v34 = vpack.c.bf16 %v128_v33, %v127_v32 }
  0xfe   :  { %272 = vmatmul.mubr.msk.bf16.vlgmr.msra.gmra.mrb[0].mxu1 %vm164_vm2, %v131_v34 }
 0x1d1   :  { %v202_v36 = vpop.f32.mrb[0].mxu1 }
 0x1d2   :  { %v209_v38 = vadd.f32 %v202_v36, %v129_v35  ;;  %v273_v39 = vpop.f32.mrb[1].mxu1 }
 0x1d3   :  { %v205_v40 = vpop.f32.mrb[2].mxu1 }
 0x1d4   :  { %211 = vst.msk [vmem:[#allocation2] sm:$0xff] %vm33_vm1, %v209_v38  ;;  %v210_v41 = vadd.f32 %v205_v40, %v130_v37  ;;  %v274_v42 = vpop.f32.mrb[3].mxu1 }
 0x1d6   :  { %212 = vst.msk [vmem:[#allocation2 + $0x8] sm:$0xff] %vm33_vm1, %v210_v41 }
 0x1db   :  { %v216_v43 = vld [vmem:[#allocation2] sm:$0xff] }
 0x1dc   :  { %218 = vst.msk [vmem:[#allocation3] sm:$0xff] %vm33_vm1, %v216_v43 }
 0x1dd   :  { %v217_v44 = vld [vmem:[#allocation2 + $0x8] sm:$0xff] }
 0x1de   :  { %219 = vst.msk [vmem:[#allocation3 + $0x8] sm:$0xff] %vm33_vm1, %v217_v44 }
 0x1df   :  { %302 = shalt.err (!%p299_p4)
}
 0x1e0   :  { %s303_s11 = scalar_lea.hbm %s401_s5, 256 }
 0x1e1   :  { %p304_p5 = scmp.ne.s32.totalorder %s401_s5, %s303_s11  ;;  %p307_p6 = scmp.lt.u32.totalorder %s303_s11, %s401_s5 }
 0x1e3   :  { %p309_p7 = pnand %p307_p6, %p304_p5 }
 0x1e5   :  { %312 = shalt.err (!%p309_p7)
}
 0x1e6   :  { %s318_s16 = smov 128   ;;  %s319_s17 = smov 8  }
 0x1e7   :  { %231 = dma.vmem_to_hbm [thread:$0]  %s226_s3, 256, %s401_s5, [#allocation4], %s318_s16, %s318_s16, %s319_s17  }
 0x1e8   :  { %313 = dma.done.wait [#allocation4], 256  }
 0x1e9   :  { %314 = vsyncadd [#allocation4], 4294967040 }
 0x1ea   :  { %235 = vsyncpa [#allocation4], 1 }

</bundles_post_ra>
